<compile_context>
chip_gen: v5e
topology: v5e:2x2
jax: 0.10.0
libtpu: 0.0.40
codegen_flags: <defaults>
</compile_context>

<pallas_src>
import functools
import math

import jax
import jax.numpy as jnp
from jax import lax
from jax.experimental import pallas as pl
from jax.experimental.pallas import tpu as pltpu


# ---------------------------------------------------------------------------
# Kernel 1: fused Graph2dConvolution forward (one batch element per grid step)
# ---------------------------------------------------------------------------
def _gcn_fused_kernel(hi_ref, x_ref, m_ref, w_ref, cmask_ref, y_ref, fpad_ref,
                      *, block_num, width):
    C, P = x_ref.shape[1], x_ref.shape[2]
    F = y_ref.shape[1]
    K = block_num
    W = width
    f32 = jnp.float32

    hi = hi_ref[0]                                   # (C, P) highpass (index source)
    x = x_ref[0]                                     # (C, P) input features
    M = m_ref[...]                                   # (C, C) = Wg @ Wg.T (symmetric)

    # ---- channel argmax (torch.max over dim=1; first index wins ties) ------
    best = hi[0:1, :]                                # (1, P)
    idx = jnp.zeros((1, P), jnp.int32)
    for c in range(1, C):
        v = hi[c:c + 1, :]
        upd = v > best
        best = jnp.where(upd, v, best)
        idx = jnp.where(upd, jnp.int32(c), idx)

    # ---- one-hot block membership, lane-dense (K, P), kept in vregs --------
    onehot = (lax.broadcasted_iota(jnp.int32, (K, P), 0) == idx).astype(f32)

    # ---- per-block sums / pixel counts with a single MXU contraction -------
    sums = lax.dot_general(onehot, x, (((1,), (1,)), ((), ())),
                           preferred_element_type=f32)             # (K, C)
    counts = jnp.sum(onehot, axis=1, keepdims=True)                # (K, 1)
    means = sums / (counts + (counts == 0).astype(f32))            # (K, C)

    # ---- adjacency adj[i,j] = exp(-(m_i-m_j)^T M (m_i-m_j)), zero diagonal.
    #      With G = means @ M @ means^T and M symmetric: quad = G_ii+G_jj-2G_ij
    q = jnp.dot(means, M, preferred_element_type=f32)              # (K, C)
    g = lax.dot_general(q, means, (((1,), (1,)), ((), ())),
                        preferred_element_type=f32)                # (K, K)
    eye = (lax.broadcasted_iota(jnp.int32, (K, K), 0) ==
           lax.broadcasted_iota(jnp.int32, (K, K), 1)).astype(f32)
    diag_col = jnp.sum(g * eye, axis=1, keepdims=True)             # (K, 1)
    diag_row = jnp.sum(g * eye, axis=0, keepdims=True)             # (1, K)
    quad = diag_col + diag_row - 2.0 * g
    adj = jnp.exp(-quad) * (1.0 - eye)                             # zero diagonal
    adjm = jnp.dot(adj, means, preferred_element_type=f32)         # (K, C)

    # ---- features = x + adj_means[block(p)]  (one-hot gather on the MXU) ---
    feat = x + lax.dot_general(adjm, onehot, (((0,), (0,)), ((), ())),
                               preferred_element_type=f32)         # (C, P)

    # ---- 3x3 conv, stride 1, pad 1, no bias: write feat into a row-padded
    #      flat VMEM buffer, take 9 statically shifted (C, P) slices and
    #      accumulate (F,C)@(C,P) matmuls.  Column wrap-around across rows is
    #      cancelled by the precomputed lane masks (left / right column).
    fpad_ref[...] = jnp.zeros_like(fpad_ref)                       # (C, P+2W+2)
    fpad_ref[:, W + 1:W + 1 + P] = feat

    acc = jnp.zeros((F, P), f32)
    t = 0
    for di in (-1, 0, 1):
        for dj in (-1, 0, 1):
            start = (W + 1) + di * W + dj                          # static offset
            shifted = fpad_ref[:, start:start + P]                 # (C, P)
            if dj == -1:
                shifted = shifted * cmask_ref[0:1, :]
            elif dj == 1:
                shifted = shifted * cmask_ref[1:2, :]
            acc = acc + jnp.dot(w_ref[t], shifted,
                                preferred_element_type=f32)        # (F, P)
            t += 1
    y_ref[0] = acc


# ---------------------------------------------------------------------------
# Kernel 2: BatchNorm2d in training mode (batch statistics, biased variance).
# Needs full-batch stats -> single grid step over the whole (B, F, P) tensor.
# ---------------------------------------------------------------------------
def _bn_kernel(y_ref, g_ref, b_ref, o_ref):
    B, F, P = y_ref.shape
    n = B * P
    s = jnp.zeros((F, 1), jnp.float32)
    for b in range(B):
        s = s + jnp.sum(y_ref[b], axis=1, keepdims=True)
    mean = s * (1.0 / n)
    ss = jnp.zeros((F, 1), jnp.float32)
    for b in range(B):
        d = y_ref[b] - mean
        ss = ss + jnp.sum(d * d, axis=1, keepdims=True)
    inv = lax.rsqrt(ss * (1.0 / n) + 1e-5)
    scale = inv * g_ref[...]                                       # (F, 1)
    shift = b_ref[...] - mean * scale                              # (F, 1)
    for b in range(B):
        o_ref[b] = y_ref[b] * scale + shift


# ---------------------------------------------------------------------------
# Plain-JAX glue
# ---------------------------------------------------------------------------
def contour_dec0(x_nchw):
    # TODO(synk): ContourDec source is not provided; substituted a Laplacian-pyramid
    # style (lowpass, highpass) split with the same output shapes as ContourDec(0).
    b, c, h, w = x_nchw.shape
    lo = x_nchw.reshape(b, c, h // 2, 2, w // 2, 2).mean(axis=(3, 5))
    hi = x_nchw - jnp.repeat(jnp.repeat(lo, 2, axis=2), 2, axis=3)
    return lo, hi


def gcn_forward(x_nchw, params):
    B, C, H, W = x_nchw.shape
    P = H * W
    K = params["block_num"]
    conv_w = params["conv_w"]                         # (F, C, 3, 3)
    F = conv_w.shape[0]
    f32 = jnp.float32

    # NOTE: self.convindex(x) in the reference forward is dead code (its result is
    # immediately overwritten by ctindex), so it is not computed here.
    _, hi = contour_dec0(x_nchw)

    # Lane-dense (B, C, P) layout: a free reshape, no NCHW<->NPC transposes.
    x_bcp = x_nchw.reshape(B, C, P).astype(f32)
    hi_bcp = hi.reshape(B, C, P).astype(f32)

    M = jnp.dot(params["W"], params["W"].T).astype(f32)            # (C, C), tiny glue
    w9 = conv_w.transpose(2, 3, 0, 1).reshape(9, F, C).astype(f32) # tap-major weights

    col = jnp.arange(P, dtype=jnp.int32) % W
    cmask = jnp.stack([(col != 0).astype(f32),                     # dj = -1 validity
                       (col != W - 1).astype(f32)])                # dj = +1 validity

    kernel = functools.partial(_gcn_fused_kernel, block_num=K, width=W)
    y = pl.pallas_call(
        kernel,
        out_shape=jax.ShapeDtypeStruct((B, F, P), f32),
        grid=(B,),
        in_specs=[pl.BlockSpec((1, C, P), lambda b: (b, 0, 0)),
                  pl.BlockSpec((1, C, P), lambda b: (b, 0, 0)),
                  pl.BlockSpec((C, C), lambda b: (0, 0)),
                  pl.BlockSpec((9, F, C), lambda b: (0, 0, 0)),
                  pl.BlockSpec((2, P), lambda b: (0, 0))],
        out_specs=pl.BlockSpec((1, F, P), lambda b: (b, 0, 0)),
        scratch_shapes=[pltpu.VMEM((C, P + 2 * W + 2), f32)],
        compiler_params=pltpu.CompilerParams(dimension_semantics=("parallel",)),
    )(hi_bcp, x_bcp, M, w9, cmask)

    y_bn = pl.pallas_call(
        _bn_kernel,
        out_shape=jax.ShapeDtypeStruct((B, F, P), f32),
    )(y,
      params["bn_gamma"].reshape(F, 1).astype(f32),
      params["bn_beta"].reshape(F, 1).astype(f32))

    return y_bn.reshape(B, F, H, W)


def init_params(key, nfeat, ofeat, block_num):
    kW, kconv = jax.random.split(key)
    stdv = 1.0 / math.sqrt(nfeat)                     # GCN W init: uniform(-1/sqrt(C), 1/sqrt(C))
    Wg = jax.random.uniform(kW, (nfeat, nfeat), jnp.float32, -stdv, stdv)
    bound = 1.0 / math.sqrt(nfeat * 9)                # conv weight, bias=False in the reference
    conv_w = jax.random.uniform(kconv, (ofeat, nfeat, 3, 3), jnp.float32, -bound, bound)
    return {"W": Wg,
            "conv_w": conv_w,
            "bn_gamma": jnp.ones((ofeat,), jnp.float32),   # BatchNorm2d default init
            "bn_beta": jnp.zeros((ofeat,), jnp.float32),
            "block_num": block_num}


if __name__ == "__main__":
    nfeat, ofeat, block_num = 4, 8, 4
    B, H, W = 2, 16, 16
    key = jax.random.PRNGKey(0)
    kx, kp = jax.random.split(key)
    x = jax.random.normal(kx, (B, nfeat, H, W), jnp.float32)
    params = init_params(kp, nfeat, ofeat, block_num)

    out = jax.jit(lambda inp: gcn_forward(inp, params))(x)
    jax.block_until_ready(out)
    assert out.shape == (B, ofeat, H, W) and out.dtype == jnp.float32
    assert bool(jnp.all(jnp.isfinite(out)))
    print("KERNEL_OK")
</pallas_src>

<mosaic_0001>
module attributes {stable_mosaic.version = 11 : i64} {
  func.func @_gcn_fused_kernel(%arg0: i32, %arg1: memref<1x4x256xf32, #tpu.memory_space<vmem>>, %arg2: memref<1x4x256xf32, #tpu.memory_space<vmem>>, %arg3: memref<4x4xf32, #tpu.memory_space<vmem>>, %arg4: memref<9x8x4xf32, #tpu.memory_space<vmem>>, %arg5: memref<2x256xf32, #tpu.memory_space<vmem>>, %arg6: memref<1x8x256xf32, #tpu.memory_space<vmem>>, %arg7: memref<4x290xf32, #tpu.memory_space<vmem>>) attributes {dimension_semantics = [#tpu.dimension_semantics<parallel>], iteration_bounds = array<i64: 2>, scalar_prefetch = 0 : i64, scratch_operands = 1 : i64, tpu.core_type = #tpu.core_type<tc>, window_params = [{transform_indices = @transform_0, window_bounds = array<i64: 1, 4, 256>}, {transform_indices = @transform_1, window_bounds = array<i64: 1, 4, 256>}, {pipeline_mode = #tpu.pipeline_mode<synchronous>, transform_indices = @transform_2, window_bounds = array<i64: 4, 4>}, {pipeline_mode = #tpu.pipeline_mode<synchronous>, transform_indices = @transform_3, window_bounds = array<i64: 9, 8, 4>}, {pipeline_mode = #tpu.pipeline_mode<synchronous>, transform_indices = @transform_4, window_bounds = array<i64: 2, 256>}, {transform_indices = @transform_5, window_bounds = array<i64: 1, 8, 256>}]} {
    %c0 = arith.constant 0 : index
    %c0_0 = arith.constant 0 : index
    %c0_1 = arith.constant 0 : index
    %0 = vector.load %arg1[%c0, %c0_0, %c0_1] : memref<1x4x256xf32, #tpu.memory_space<vmem>>, vector<1x4x256xf32>
    %1 = vector.shape_cast %0 : vector<1x4x256xf32> to vector<4x256xf32>
    %c0_2 = arith.constant 0 : index
    %c0_3 = arith.constant 0 : index
    %c0_4 = arith.constant 0 : index
    %2 = vector.load %arg2[%c0_2, %c0_3, %c0_4] : memref<1x4x256xf32, #tpu.memory_space<vmem>>, vector<1x4x256xf32>
    %3 = vector.shape_cast %2 : vector<1x4x256xf32> to vector<4x256xf32>
    %c0_5 = arith.constant 0 : index
    %c0_6 = arith.constant 0 : index
    %4 = vector.load %arg3[%c0_5, %c0_6] : memref<4x4xf32, #tpu.memory_space<vmem>>, vector<4x4xf32>
    %5 = vector.extract_strided_slice %1 {offsets = [0, 0], sizes = [1, 256], strides = [1, 1]} : vector<4x256xf32> to vector<1x256xf32>
    %c0_i32 = arith.constant 0 : i32
    %6 = vector.broadcast %c0_i32 : i32 to vector<1x256xi32>
    %7 = vector.extract_strided_slice %1 {offsets = [1, 0], sizes = [1, 256], strides = [1, 1]} : vector<4x256xf32> to vector<1x256xf32>
    %8 = arith.cmpf ogt, %7, %5 : vector<1x256xf32>
    %9 = arith.select %8, %7, %5 : vector<1x256xi1>, vector<1x256xf32>
    %c1_i32 = arith.constant 1 : i32
    %10 = vector.broadcast %c1_i32 : i32 to vector<1x256xi32>
    %11 = arith.select %8, %10, %6 : vector<1x256xi1>, vector<1x256xi32>
    %12 = vector.extract_strided_slice %1 {offsets = [2, 0], sizes = [1, 256], strides = [1, 1]} : vector<4x256xf32> to vector<1x256xf32>
    %13 = arith.cmpf ogt, %12, %9 : vector<1x256xf32>
    %14 = arith.select %13, %12, %9 : vector<1x256xi1>, vector<1x256xf32>
    %c2_i32 = arith.constant 2 : i32
    %15 = vector.broadcast %c2_i32 : i32 to vector<1x256xi32>
    %16 = arith.select %13, %15, %11 : vector<1x256xi1>, vector<1x256xi32>
    %17 = vector.extract_strided_slice %1 {offsets = [3, 0], sizes = [1, 256], strides = [1, 1]} : vector<4x256xf32> to vector<1x256xf32>
    %18 = arith.cmpf ogt, %17, %14 : vector<1x256xf32>
    %c3_i32 = arith.constant 3 : i32
    %19 = vector.broadcast %c3_i32 : i32 to vector<1x256xi32>
    %20 = arith.select %18, %19, %16 : vector<1x256xi1>, vector<1x256xi32>
    %21 = tpu.iota {dimensions = array<i32: 0>} : vector<4x256xi32>
    %22 = vector.broadcast %20 : vector<1x256xi32> to vector<4x256xi32>
    %23 = arith.cmpi eq, %21, %22 : vector<4x256xi32>
    %24 = arith.extui %23 : vector<4x256xi1> to vector<4x256xi32>
    %25 = arith.sitofp %24 : vector<4x256xi32> to vector<4x256xf32>
    %cst = arith.constant dense<0.000000e+00> : vector<4x4xf32>
    %26 = tpu.matmul %25, %3, %cst {dimension_numbers = #tpu.dot_dimension_numbers<[1], [1], [0], [0], [0, 0, 1, 0], [], []>} : vector<4x256xf32>, vector<4x256xf32>, vector<4x4xf32> -> vector<4x4xf32>
    %cst_7 = arith.constant dense<0.000000e+00> : vector<4xf32>
    %27 = vector.multi_reduction <add>, %25, %cst_7 [1] : vector<4x256xf32> to vector<4xf32>
    %28 = vector.shape_cast %27 : vector<4xf32> to vector<4x1xf32>
    %cst_8 = arith.constant 0.000000e+00 : f32
    %29 = vector.broadcast %cst_8 : f32 to vector<4x1xf32>
    %30 = arith.cmpf oeq, %28, %29 : vector<4x1xf32>
    %31 = arith.extui %30 : vector<4x1xi1> to vector<4x1xi32>
    %32 = arith.sitofp %31 : vector<4x1xi32> to vector<4x1xf32>
    %33 = arith.addf %28, %32 : vector<4x1xf32>
    %34 = vector.broadcast %33 : vector<4x1xf32> to vector<4x4xf32>
    %35 = arith.divf %26, %34 : vector<4x4xf32>
    %cst_9 = arith.constant dense<0.000000e+00> : vector<4x4xf32>
    %36 = tpu.matmul %35, %4, %cst_9 {dimension_numbers = #tpu.dot_dimension_numbers<[1], [0], [0], [1], [0, 0, 1, 1], [], []>} : vector<4x4xf32>, vector<4x4xf32>, vector<4x4xf32> -> vector<4x4xf32>
    %cst_10 = arith.constant dense<0.000000e+00> : vector<4x4xf32>
    %37 = tpu.matmul %36, %35, %cst_10 {dimension_numbers = #tpu.dot_dimension_numbers<[1], [1], [0], [0], [0, 0, 1, 0], [], []>} : vector<4x4xf32>, vector<4x4xf32>, vector<4x4xf32> -> vector<4x4xf32>
    %38 = tpu.iota {dimensions = array<i32: 0>} : vector<4x4xi32>
    %39 = tpu.iota {dimensions = array<i32: 1>} : vector<4x4xi32>
    %40 = arith.cmpi eq, %38, %39 : vector<4x4xi32>
    %41 = arith.extui %40 : vector<4x4xi1> to vector<4x4xi32>
    %42 = arith.sitofp %41 : vector<4x4xi32> to vector<4x4xf32>
    %43 = arith.mulf %37, %42 : vector<4x4xf32>
    %cst_11 = arith.constant dense<0.000000e+00> : vector<4xf32>
    %44 = vector.multi_reduction <add>, %43, %cst_11 [1] : vector<4x4xf32> to vector<4xf32>
    %45 = vector.shape_cast %44 : vector<4xf32> to vector<4x1xf32>
    %46 = arith.mulf %37, %42 : vector<4x4xf32>
    %cst_12 = arith.constant dense<0.000000e+00> : vector<4xf32>
    %47 = vector.multi_reduction <add>, %46, %cst_12 [0] : vector<4x4xf32> to vector<4xf32>
    %48 = vector.shape_cast %47 : vector<4xf32> to vector<1x4xf32>
    %49 = vector.broadcast %45 : vector<4x1xf32> to vector<4x4xf32>
    %50 = vector.broadcast %48 : vector<1x4xf32> to vector<4x4xf32>
    %51 = arith.addf %49, %50 : vector<4x4xf32>
    %cst_13 = arith.constant 2.000000e+00 : f32
    %52 = vector.broadcast %cst_13 : f32 to vector<4x4xf32>
    %53 = arith.mulf %52, %37 : vector<4x4xf32>
    %54 = arith.subf %51, %53 : vector<4x4xf32>
    %cst_14 = arith.constant 0.000000e+00 : f32
    %55 = vector.broadcast %cst_14 : f32 to vector<4x4xf32>
    %56 = arith.subf %55, %54 : vector<4x4xf32>
    %57 = math.exp %56 : vector<4x4xf32>
    %cst_15 = arith.constant 1.000000e+00 : f32
    %58 = vector.broadcast %cst_15 : f32 to vector<4x4xf32>
    %59 = arith.subf %58, %42 : vector<4x4xf32>
    %60 = arith.mulf %57, %59 : vector<4x4xf32>
    %cst_16 = arith.constant dense<0.000000e+00> : vector<4x4xf32>
    %61 = tpu.matmul %60, %35, %cst_16 {dimension_numbers = #tpu.dot_dimension_numbers<[1], [0], [0], [1], [0, 0, 1, 1], [], []>} : vector<4x4xf32>, vector<4x4xf32>, vector<4x4xf32> -> vector<4x4xf32>
    %cst_17 = arith.constant dense<0.000000e+00> : vector<4x256xf32>
    %62 = tpu.matmul %61, %25, %cst_17 {dimension_numbers = #tpu.dot_dimension_numbers<[0], [0], [1], [1], [0, 1, 1, 1], [], []>} : vector<4x4xf32>, vector<4x256xf32>, vector<4x256xf32> -> vector<4x256xf32>
    %63 = arith.addf %3, %62 : vector<4x256xf32>
    %cst_18 = arith.constant 0.000000e+00 : f32
    %64 = vector.broadcast %cst_18 : f32 to vector<4x290xf32>
    %c0_19 = arith.constant 0 : index
    %c0_20 = arith.constant 0 : index
    %65 = vector.load %arg7[%c0_19, %c0_20] : memref<4x290xf32, #tpu.memory_space<vmem>>, vector<4x290xf32>
    tpu.vector_store %arg7[%c0_19, %c0_20], %64 {strides = array<i32>} : memref<4x290xf32, #tpu.memory_space<vmem>>, vector<4x290xf32>,
    %c0_21 = arith.constant 0 : index
    %c17 = arith.constant 17 : index
    %66 = vector.load %arg7[%c0_21, %c17] : memref<4x290xf32, #tpu.memory_space<vmem>>, vector<4x256xf32>
    tpu.vector_store %arg7[%c0_21, %c17], %63 {strides = array<i32>} : memref<4x290xf32, #tpu.memory_space<vmem>>, vector<4x256xf32>,
    %cst_22 = arith.constant 0.000000e+00 : f32
    %67 = vector.broadcast %cst_22 : f32 to vector<8x256xf32>
    %c0_23 = arith.constant 0 : index
    %c0_24 = arith.constant 0 : index
    %68 = vector.load %arg7[%c0_23, %c0_24] : memref<4x290xf32, #tpu.memory_space<vmem>>, vector<4x256xf32>
    %c0_25 = arith.constant 0 : index
    %c0_26 = arith.constant 0 : index
    %69 = vector.load %arg5[%c0_25, %c0_26] : memref<2x256xf32, #tpu.memory_space<vmem>>, vector<1x256xf32>
    %70 = vector.broadcast %69 : vector<1x256xf32> to vector<4x256xf32>
    %71 = arith.mulf %68, %70 : vector<4x256xf32>
    %c0_27 = arith.constant 0 : index
    %c0_28 = arith.constant 0 : index
    %c0_29 = arith.constant 0 : index
    %72 = vector.load %arg4[%c0_27, %c0_28, %c0_29] : memref<9x8x4xf32, #tpu.memory_space<vmem>>, vector<1x8x4xf32>
    %73 = vector.shape_cast %72 : vector<1x8x4xf32> to vector<8x4xf32>
    %cst_30 = arith.constant dense<0.000000e+00> : vector<8x256xf32>
    %74 = tpu.matmul %73, %71, %cst_30 {dimension_numbers = #tpu.dot_dimension_numbers<[1], [0], [0], [1], [0, 0, 1, 1], [], []>} : vector<8x4xf32>, vector<4x256xf32>, vector<8x256xf32> -> vector<8x256xf32>
    %75 = arith.addf %67, %74 : vector<8x256xf32>
    %c0_31 = arith.constant 0 : index
    %c1 = arith.constant 1 : index
    %76 = vector.load %arg7[%c0_31, %c1] : memref<4x290xf32, #tpu.memory_space<vmem>>, vector<4x256xf32>
    %c1_32 = arith.constant 1 : index
    %c0_33 = arith.constant 0 : index
    %c0_34 = arith.constant 0 : index
    %77 = vector.load %arg4[%c1_32, %c0_33, %c0_34] : memref<9x8x4xf32, #tpu.memory_space<vmem>>, vector<1x8x4xf32>
    %78 = vector.shape_cast %77 : vector<1x8x4xf32> to vector<8x4xf32>
    %cst_35 = arith.constant dense<0.000000e+00> : vector<8x256xf32>
    %79 = tpu.matmul %78, %76, %cst_35 {dimension_numbers = #tpu.dot_dimension_numbers<[1], [0], [0], [1], [0, 0, 1, 1], [], []>} : vector<8x4xf32>, vector<4x256xf32>, vector<8x256xf32> -> vector<8x256xf32>
    %80 = arith.addf %75, %79 : vector<8x256xf32>
    %c0_36 = arith.constant 0 : index
    %c2 = arith.constant 2 : index
    %81 = vector.load %arg7[%c0_36, %c2] : memref<4x290xf32, #tpu.memory_space<vmem>>, vector<4x256xf32>
    %c1_37 = arith.constant 1 : index
    %c0_38 = arith.constant 0 : index
    %82 = vector.load %arg5[%c1_37, %c0_38] : memref<2x256xf32, #tpu.memory_space<vmem>>, vector<1x256xf32>
    %83 = vector.broadcast %82 : vector<1x256xf32> to vector<4x256xf32>
    %84 = arith.mulf %81, %83 : vector<4x256xf32>
    %c2_39 = arith.constant 2 : index
    %c0_40 = arith.constant 0 : index
    %c0_41 = arith.constant 0 : index
    %85 = vector.load %arg4[%c2_39, %c0_40, %c0_41] : memref<9x8x4xf32, #tpu.memory_space<vmem>>, vector<1x8x4xf32>
    %86 = vector.shape_cast %85 : vector<1x8x4xf32> to vector<8x4xf32>
    %cst_42 = arith.constant dense<0.000000e+00> : vector<8x256xf32>
    %87 = tpu.matmul %86, %84, %cst_42 {dimension_numbers = #tpu.dot_dimension_numbers<[1], [0], [0], [1], [0, 0, 1, 1], [], []>} : vector<8x4xf32>, vector<4x256xf32>, vector<8x256xf32> -> vector<8x256xf32>
    %88 = arith.addf %80, %87 : vector<8x256xf32>
    %c0_43 = arith.constant 0 : index
    %c16 = arith.constant 16 : index
    %89 = vector.load %arg7[%c0_43, %c16] : memref<4x290xf32, #tpu.memory_space<vmem>>, vector<4x256xf32>
    %c0_44 = arith.constant 0 : index
    %c0_45 = arith.constant 0 : index
    %90 = vector.load %arg5[%c0_44, %c0_45] : memref<2x256xf32, #tpu.memory_space<vmem>>, vector<1x256xf32>
    %91 = vector.broadcast %90 : vector<1x256xf32> to vector<4x256xf32>
    %92 = arith.mulf %89, %91 : vector<4x256xf32>
    %c3 = arith.constant 3 : index
    %c0_46 = arith.constant 0 : index
    %c0_47 = arith.constant 0 : index
    %93 = vector.load %arg4[%c3, %c0_46, %c0_47] : memref<9x8x4xf32, #tpu.memory_space<vmem>>, vector<1x8x4xf32>
    %94 = vector.shape_cast %93 : vector<1x8x4xf32> to vector<8x4xf32>
    %cst_48 = arith.constant dense<0.000000e+00> : vector<8x256xf32>
    %95 = tpu.matmul %94, %92, %cst_48 {dimension_numbers = #tpu.dot_dimension_numbers<[1], [0], [0], [1], [0, 0, 1, 1], [], []>} : vector<8x4xf32>, vector<4x256xf32>, vector<8x256xf32> -> vector<8x256xf32>
    %96 = arith.addf %88, %95 : vector<8x256xf32>
    %c0_49 = arith.constant 0 : index
    %c17_50 = arith.constant 17 : index
    %97 = vector.load %arg7[%c0_49, %c17_50] : memref<4x290xf32, #tpu.memory_space<vmem>>, vector<4x256xf32>
    %c4 = arith.constant 4 : index
    %c0_51 = arith.constant 0 : index
    %c0_52 = arith.constant 0 : index
    %98 = vector.load %arg4[%c4, %c0_51, %c0_52] : memref<9x8x4xf32, #tpu.memory_space<vmem>>, vector<1x8x4xf32>
    %99 = vector.shape_cast %98 : vector<1x8x4xf32> to vector<8x4xf32>
    %cst_53 = arith.constant dense<0.000000e+00> : vector<8x256xf32>
    %100 = tpu.matmul %99, %97, %cst_53 {dimension_numbers = #tpu.dot_dimension_numbers<[1], [0], [0], [1], [0, 0, 1, 1], [], []>} : vector<8x4xf32>, vector<4x256xf32>, vector<8x256xf32> -> vector<8x256xf32>
    %101 = arith.addf %96, %100 : vector<8x256xf32>
    %c0_54 = arith.constant 0 : index
    %c18 = arith.constant 18 : index
    %102 = vector.load %arg7[%c0_54, %c18] : memref<4x290xf32, #tpu.memory_space<vmem>>, vector<4x256xf32>
    %c1_55 = arith.constant 1 : index
    %c0_56 = arith.constant 0 : index
    %103 = vector.load %arg5[%c1_55, %c0_56] : memref<2x256xf32, #tpu.memory_space<vmem>>, vector<1x256xf32>
    %104 = vector.broadcast %103 : vector<1x256xf32> to vector<4x256xf32>
    %105 = arith.mulf %102, %104 : vector<4x256xf32>
    %c5 = arith.constant 5 : index
    %c0_57 = arith.constant 0 : index
    %c0_58 = arith.constant 0 : index
    %106 = vector.load %arg4[%c5, %c0_57, %c0_58] : memref<9x8x4xf32, #tpu.memory_space<vmem>>, vector<1x8x4xf32>
    %107 = vector.shape_cast %106 : vector<1x8x4xf32> to vector<8x4xf32>
    %cst_59 = arith.constant dense<0.000000e+00> : vector<8x256xf32>
    %108 = tpu.matmul %107, %105, %cst_59 {dimension_numbers = #tpu.dot_dimension_numbers<[1], [0], [0], [1], [0, 0, 1, 1], [], []>} : vector<8x4xf32>, vector<4x256xf32>, vector<8x256xf32> -> vector<8x256xf32>
    %109 = arith.addf %101, %108 : vector<8x256xf32>
    %c0_60 = arith.constant 0 : index
    %c32 = arith.constant 32 : index
    %110 = vector.load %arg7[%c0_60, %c32] : memref<4x290xf32, #tpu.memory_space<vmem>>, vector<4x256xf32>
    %c0_61 = arith.constant 0 : index
    %c0_62 = arith.constant 0 : index
    %111 = vector.load %arg5[%c0_61, %c0_62] : memref<2x256xf32, #tpu.memory_space<vmem>>, vector<1x256xf32>
    %112 = vector.broadcast %111 : vector<1x256xf32> to vector<4x256xf32>
    %113 = arith.mulf %110, %112 : vector<4x256xf32>
    %c6 = arith.constant 6 : index
    %c0_63 = arith.constant 0 : index
    %c0_64 = arith.constant 0 : index
    %114 = vector.load %arg4[%c6, %c0_63, %c0_64] : memref<9x8x4xf32, #tpu.memory_space<vmem>>, vector<1x8x4xf32>
    %115 = vector.shape_cast %114 : vector<1x8x4xf32> to vector<8x4xf32>
    %cst_65 = arith.constant dense<0.000000e+00> : vector<8x256xf32>
    %116 = tpu.matmul %115, %113, %cst_65 {dimension_numbers = #tpu.dot_dimension_numbers<[1], [0], [0], [1], [0, 0, 1, 1], [], []>} : vector<8x4xf32>, vector<4x256xf32>, vector<8x256xf32> -> vector<8x256xf32>
    %117 = arith.addf %109, %116 : vector<8x256xf32>
    %c0_66 = arith.constant 0 : index
    %c33 = arith.constant 33 : index
    %118 = vector.load %arg7[%c0_66, %c33] : memref<4x290xf32, #tpu.memory_space<vmem>>, vector<4x256xf32>
    %c7 = arith.constant 7 : index
    %c0_67 = arith.constant 0 : index
    %c0_68 = arith.constant 0 : index
    %119 = vector.load %arg4[%c7, %c0_67, %c0_68] : memref<9x8x4xf32, #tpu.memory_space<vmem>>, vector<1x8x4xf32>
    %120 = vector.shape_cast %119 : vector<1x8x4xf32> to vector<8x4xf32>
    %cst_69 = arith.constant dense<0.000000e+00> : vector<8x256xf32>
    %121 = tpu.matmul %120, %118, %cst_69 {dimension_numbers = #tpu.dot_dimension_numbers<[1], [0], [0], [1], [0, 0, 1, 1], [], []>} : vector<8x4xf32>, vector<4x256xf32>, vector<8x256xf32> -> vector<8x256xf32>
    %122 = arith.addf %117, %121 : vector<8x256xf32>
    %c0_70 = arith.constant 0 : index
    %c34 = arith.constant 34 : index
    %123 = vector.load %arg7[%c0_70, %c34] : memref<4x290xf32, #tpu.memory_space<vmem>>, vector<4x256xf32>
    %c1_71 = arith.constant 1 : index
    %c0_72 = arith.constant 0 : index
    %124 = vector.load %arg5[%c1_71, %c0_72] : memref<2x256xf32, #tpu.memory_space<vmem>>, vector<1x256xf32>
    %125 = vector.broadcast %124 : vector<1x256xf32> to vector<4x256xf32>
    %126 = arith.mulf %123, %125 : vector<4x256xf32>
    %c8 = arith.constant 8 : index
    %c0_73 = arith.constant 0 : index
    %c0_74 = arith.constant 0 : index
    %127 = vector.load %arg4[%c8, %c0_73, %c0_74] : memref<9x8x4xf32, #tpu.memory_space<vmem>>, vector<1x8x4xf32>
    %128 = vector.shape_cast %127 : vector<1x8x4xf32> to vector<8x4xf32>
    %cst_75 = arith.constant dense<0.000000e+00> : vector<8x256xf32>
    %129 = tpu.matmul %128, %126, %cst_75 {dimension_numbers = #tpu.dot_dimension_numbers<[1], [0], [0], [1], [0, 0, 1, 1], [], []>} : vector<8x4xf32>, vector<4x256xf32>, vector<8x256xf32> -> vector<8x256xf32>
    %130 = arith.addf %122, %129 : vector<8x256xf32>
    %c0_76 = arith.constant 0 : index
    %c0_77 = arith.constant 0 : index
    %c0_78 = arith.constant 0 : index
    %131 = vector.load %arg6[%c0_76, %c0_77, %c0_78] : memref<1x8x256xf32, #tpu.memory_space<vmem>>, vector<1x8x256xf32>
    %132 = vector.shape_cast %131 : vector<1x8x256xf32> to vector<8x256xf32>
    %133 = vector.shape_cast %130 : vector<8x256xf32> to vector<1x8x256xf32>
    tpu.vector_store %arg6[%c0_76, %c0_77, %c0_78], %133 {strides = array<i32>} : memref<1x8x256xf32, #tpu.memory_space<vmem>>, vector<1x8x256xf32>,
    return
  }
  func.func @transform_0(%arg0: i32) -> (i32, i32, i32) {
    %c0_i32 = arith.constant 0 : i32
    %c0_i32_0 = arith.constant 0 : i32
    %c0_i32_1 = arith.constant 0 : i32
    return %arg0, %c0_i32, %c0_i32_0 : i32, i32, i32
  }
  func.func @transform_1(%arg0: i32) -> (i32, i32, i32) {
    %c0_i32 = arith.constant 0 : i32
    %c0_i32_0 = arith.constant 0 : i32
    %c0_i32_1 = arith.constant 0 : i32
    return %arg0, %c0_i32, %c0_i32_0 : i32, i32, i32
  }
  func.func @transform_2(%arg0: i32) -> (i32, i32) {
    %c0_i32 = arith.constant 0 : i32
    %c0_i32_0 = arith.constant 0 : i32
    %c0_i32_1 = arith.constant 0 : i32
    return %c0_i32, %c0_i32_0 : i32, i32
  }
  func.func @transform_3(%arg0: i32) -> (i32, i32, i32) {
    %c0_i32 = arith.constant 0 : i32
    %c0_i32_0 = arith.constant 0 : i32
    %c0_i32_1 = arith.constant 0 : i32
    %c0_i32_2 = arith.constant 0 : i32
    return %c0_i32, %c0_i32_0, %c0_i32_1 : i32, i32, i32
  }
  func.func @transform_4(%arg0: i32) -> (i32, i32) {
    %c0_i32 = arith.constant 0 : i32
    %c0_i32_0 = arith.constant 0 : i32
    %c0_i32_1 = arith.constant 0 : i32
    return %c0_i32, %c0_i32_0 : i32, i32
  }
  func.func @transform_5(%arg0: i32) -> (i32, i32, i32) {
    %c0_i32 = arith.constant 0 : i32
    %c0_i32_0 = arith.constant 0 : i32
    %c0_i32_1 = arith.constant 0 : i32
    return %arg0, %c0_i32, %c0_i32_0 : i32, i32, i32
  }
}

module attributes {stable_mosaic.version = 11 : i64} {
  func.func @_bn_kernel(%arg0: memref<2x8x256xf32, #tpu.memory_space<vmem>>, %arg1: memref<8x1xf32, #tpu.memory_space<vmem>>, %arg2: memref<8x1xf32, #tpu.memory_space<vmem>>, %arg3: memref<2x8x256xf32, #tpu.memory_space<vmem>>) attributes {dimension_semantics = [], scalar_prefetch = 0 : i64, scratch_operands = 0 : i64, tpu.core_type = #tpu.core_type<tc>} {
    %cst = arith.constant 0.000000e+00 : f32
    %0 = vector.broadcast %cst : f32 to vector<8x1xf32>
    %c0 = arith.constant 0 : index
    %c0_0 = arith.constant 0 : index
    %c0_1 = arith.constant 0 : index
    %1 = vector.load %arg0[%c0, %c0_0, %c0_1] : memref<2x8x256xf32, #tpu.memory_space<vmem>>, vector<1x8x256xf32>
    %2 = vector.shape_cast %1 : vector<1x8x256xf32> to vector<8x256xf32>
    %cst_2 = arith.constant dense<0.000000e+00> : vector<8xf32>
    %3 = vector.multi_reduction <add>, %2, %cst_2 [1] : vector<8x256xf32> to vector<8xf32>
    %4 = vector.shape_cast %3 : vector<8xf32> to vector<8x1xf32>
    %5 = arith.addf %0, %4 : vector<8x1xf32>
    %c1 = arith.constant 1 : index
    %c0_3 = arith.constant 0 : index
    %c0_4 = arith.constant 0 : index
    %6 = vector.load %arg0[%c1, %c0_3, %c0_4] : memref<2x8x256xf32, #tpu.memory_space<vmem>>, vector<1x8x256xf32>
    %7 = vector.shape_cast %6 : vector<1x8x256xf32> to vector<8x256xf32>
    %cst_5 = arith.constant dense<0.000000e+00> : vector<8xf32>
    %8 = vector.multi_reduction <add>, %7, %cst_5 [1] : vector<8x256xf32> to vector<8xf32>
    %9 = vector.shape_cast %8 : vector<8xf32> to vector<8x1xf32>
    %10 = arith.addf %5, %9 : vector<8x1xf32>
    %cst_6 = arith.constant 0.001953125 : f32
    %11 = vector.broadcast %cst_6 : f32 to vector<8x1xf32>
    %12 = arith.mulf %10, %11 : vector<8x1xf32>
    %cst_7 = arith.constant 0.000000e+00 : f32
    %13 = vector.broadcast %cst_7 : f32 to vector<8x1xf32>
    %c0_8 = arith.constant 0 : index
    %c0_9 = arith.constant 0 : index
    %c0_10 = arith.constant 0 : index
    %14 = vector.load %arg0[%c0_8, %c0_9, %c0_10] : memref<2x8x256xf32, #tpu.memory_space<vmem>>, vector<1x8x256xf32>
    %15 = vector.shape_cast %14 : vector<1x8x256xf32> to vector<8x256xf32>
    %16 = vector.broadcast %12 : vector<8x1xf32> to vector<8x256xf32>
    %17 = arith.subf %15, %16 : vector<8x256xf32>
    %18 = arith.mulf %17, %17 : vector<8x256xf32>
    %cst_11 = arith.constant dense<0.000000e+00> : vector<8xf32>
    %19 = vector.multi_reduction <add>, %18, %cst_11 [1] : vector<8x256xf32> to vector<8xf32>
    %20 = vector.shape_cast %19 : vector<8xf32> to vector<8x1xf32>
    %21 = arith.addf %13, %20 : vector<8x1xf32>
    %c1_12 = arith.constant 1 : index
    %c0_13 = arith.constant 0 : index
    %c0_14 = arith.constant 0 : index
    %22 = vector.load %arg0[%c1_12, %c0_13, %c0_14] : memref<2x8x256xf32, #tpu.memory_space<vmem>>, vector<1x8x256xf32>
    %23 = vector.shape_cast %22 : vector<1x8x256xf32> to vector<8x256xf32>
    %24 = vector.broadcast %12 : vector<8x1xf32> to vector<8x256xf32>
    %25 = arith.subf %23, %24 : vector<8x256xf32>
    %26 = arith.mulf %25, %25 : vector<8x256xf32>
    %cst_15 = arith.constant dense<0.000000e+00> : vector<8xf32>
    %27 = vector.multi_reduction <add>, %26, %cst_15 [1] : vector<8x256xf32> to vector<8xf32>
    %28 = vector.shape_cast %27 : vector<8xf32> to vector<8x1xf32>
    %29 = arith.addf %21, %28 : vector<8x1xf32>
    %cst_16 = arith.constant 0.001953125 : f32
    %30 = vector.broadcast %cst_16 : f32 to vector<8x1xf32>
    %31 = arith.mulf %29, %30 : vector<8x1xf32>
    %cst_17 = arith.constant 9.99999974E-6 : f32
    %32 = vector.broadcast %cst_17 : f32 to vector<8x1xf32>
    %33 = arith.addf %31, %32 : vector<8x1xf32>
    %34 = math.rsqrt %33 : vector<8x1xf32>
    %c0_18 = arith.constant 0 : index
    %c0_19 = arith.constant 0 : index
    %35 = vector.load %arg1[%c0_18, %c0_19] : memref<8x1xf32, #tpu.memory_space<vmem>>, vector<8x1xf32>
    %36 = arith.mulf %34, %35 : vector<8x1xf32>
    %c0_20 = arith.constant 0 : index
    %c0_21 = arith.constant 0 : index
    %37 = vector.load %arg2[%c0_20, %c0_21] : memref<8x1xf32, #tpu.memory_space<vmem>>, vector<8x1xf32>
    %38 = arith.mulf %12, %36 : vector<8x1xf32>
    %39 = arith.subf %37, %38 : vector<8x1xf32>
    %c0_22 = arith.constant 0 : index
    %c0_23 = arith.constant 0 : index
    %c0_24 = arith.constant 0 : index
    %40 = vector.load %arg0[%c0_22, %c0_23, %c0_24] : memref<2x8x256xf32, #tpu.memory_space<vmem>>, vector<1x8x256xf32>
    %41 = vector.shape_cast %40 : vector<1x8x256xf32> to vector<8x256xf32>
    %42 = vector.broadcast %36 : vector<8x1xf32> to vector<8x256xf32>
    %43 = arith.mulf %41, %42 : vector<8x256xf32>
    %44 = vector.broadcast %39 : vector<8x1xf32> to vector<8x256xf32>
    %45 = arith.addf %43, %44 : vector<8x256xf32>
    %c0_25 = arith.constant 0 : index
    %c0_26 = arith.constant 0 : index
    %c0_27 = arith.constant 0 : index
    %46 = vector.load %arg3[%c0_25, %c0_26, %c0_27] : memref<2x8x256xf32, #tpu.memory_space<vmem>>, vector<1x8x256xf32>
    %47 = vector.shape_cast %46 : vector<1x8x256xf32> to vector<8x256xf32>
    %48 = vector.shape_cast %45 : vector<8x256xf32> to vector<1x8x256xf32>
    tpu.vector_store %arg3[%c0_25, %c0_26, %c0_27], %48 {strides = array<i32>} : memref<2x8x256xf32, #tpu.memory_space<vmem>>, vector<1x8x256xf32>,
    %c1_28 = arith.constant 1 : index
    %c0_29 = arith.constant 0 : index
    %c0_30 = arith.constant 0 : index
    %49 = vector.load %arg0[%c1_28, %c0_29, %c0_30] : memref<2x8x256xf32, #tpu.memory_space<vmem>>, vector<1x8x256xf32>
    %50 = vector.shape_cast %49 : vector<1x8x256xf32> to vector<8x256xf32>
    %51 = vector.broadcast %36 : vector<8x1xf32> to vector<8x256xf32>
    %52 = arith.mulf %50, %51 : vector<8x256xf32>
    %53 = vector.broadcast %39 : vector<8x1xf32> to vector<8x256xf32>
    %54 = arith.addf %52, %53 : vector<8x256xf32>
    %c1_31 = arith.constant 1 : index
    %c0_32 = arith.constant 0 : index
    %c0_33 = arith.constant 0 : index
    %55 = vector.load %arg3[%c1_31, %c0_32, %c0_33] : memref<2x8x256xf32, #tpu.memory_space<vmem>>, vector<1x8x256xf32>
    %56 = vector.shape_cast %55 : vector<1x8x256xf32> to vector<8x256xf32>
    %57 = vector.shape_cast %54 : vector<8x256xf32> to vector<1x8x256xf32>
    tpu.vector_store %arg3[%c1_31, %c0_32, %c0_33], %57 {strides = array<i32>} : memref<2x8x256xf32, #tpu.memory_space<vmem>>, vector<1x8x256xf32>,
    return
  }
}

</mosaic_0001>

<bundles_post_ra>
// kernel: sub.1
= control target key start
LH: loop header
LB: loop body
LE: loop exit
PB: predicated region body
PF: predicated region fallthrough
CT: control target
= control target key end

     0   :  { %s364_s0 = inlined_call_operand.vmem [shape: f32[2,4,16,16], index: 0, kind: input, shape index: {}]   ;;  %s365_s1 = inlined_call_operand.vmem [shape: f32[2,4,16,16], index: 1, kind: input, shape index: {}]   ;;  %s366_s2 = inlined_call_operand.vmem [shape: f32[2,4,16,16], index: 2, kind: output, shape index: {}]  }
   0x1   :  { %v3_v0 = vld [vmem:[%s364_s0] sm:$0xff]  ;;  %v163_v5 = vld [vmem:[%s364_s0 + $0x10] sm:$0xff]  ;;  %v181_v23 = vld [vmem:[%s364_s0 + $0x8] sm:$0xff] }
   0x2   :  { %v4_v1 = vld [vmem:[%s365_s1] sm:$0xff]  ;;  %v164_v6 = vld [vmem:[%s365_s1 + $0x10] sm:$0xff]  ;;  %v182_v24 = vld [vmem:[%s365_s1 + $0x8] sm:$0xff] }
   0x3   :  { %v160_v2 = vld [vmem:[%s364_s0 + $0x40] sm:$0xff]  ;;  %v7_v3 = vsub.f32 %v3_v0, %v4_v1  ;;  %v26_v8 = vsub.f32 %v163_v5, %v164_v6  ;;  %v166_v9 = vld [vmem:[%s364_s0 + $0x50] sm:$0xff]  ;;  %v86_v26 = vsub.f32 %v181_v23, %v182_v24  ;;  %v184_v27 = vld [vmem:[%s364_s0 + $0x48] sm:$0xff] }
   0x4   :  { %v161_v4 = vld [vmem:[%s365_s1 + $0x40] sm:$0xff]  ;;  %v167_v10 = vld [vmem:[%s365_s1 + $0x50] sm:$0xff]  ;;  %v185_v28 = vld [vmem:[%s365_s1 + $0x48] sm:$0xff] }
   0x5   :  { %v16_v7 = vsub.f32 %v160_v2, %v161_v4  ;;  %v169_v11 = vld [vmem:[%s364_s0 + $0x20] sm:$0xff]  ;;  %9 = vst [vmem:[%s366_s2] sm:$0xff] %v7_v3  ;;  %v36_v12 = vsub.f32 %v166_v9, %v167_v10  ;;  %v175_v18 = vld [vmem:[%s364_s0 + $0x30] sm:$0xff]  ;;  %v187_v29 = vld [vmem:[%s364_s0 + $0x18] sm:$0xff]  ;;  %v96_v30 = vsub.f32 %v184_v27, %v185_v28 }
   0x6   :  { %v170_v13 = vld [vmem:[%s365_s1 + $0x20] sm:$0xff]  ;;  %v176_v19 = vld [vmem:[%s365_s1 + $0x30] sm:$0xff]  ;;  %165 = vst [vmem:[%s366_s2 + $0x10] sm:$0xff] %v26_v8  ;;  %v188_v31 = vld [vmem:[%s365_s1 + $0x18] sm:$0xff] }
   0x7   :  { %v172_v14 = vld [vmem:[%s364_s0 + $0x60] sm:$0xff]  ;;  %162 = vst [vmem:[%s366_s2 + $0x40] sm:$0xff] %v16_v7  ;;  %v46_v16 = vsub.f32 %v169_v11, %v170_v13  ;;  %v178_v20 = vld [vmem:[%s364_s0 + $0x70] sm:$0xff]  ;;  %v66_v21 = vsub.f32 %v175_v18, %v176_v19  ;;  %v190_v32 = vld [vmem:[%s364_s0 + $0x58] sm:$0xff]  ;;  %v106_v34 = vsub.f32 %v187_v29, %v188_v31 }
   0x8   :  { %v173_v15 = vld [vmem:[%s365_s1 + $0x60] sm:$0xff]  ;;  %v179_v22 = vld [vmem:[%s365_s1 + $0x70] sm:$0xff]  ;;  %168 = vst [vmem:[%s366_s2 + $0x50] sm:$0xff] %v36_v12  ;;  %v191_v33 = vld [vmem:[%s365_s1 + $0x58] sm:$0xff] }
   0x9   :  { %v56_v17 = vsub.f32 %v172_v14, %v173_v15  ;;  %v76_v25 = vsub.f32 %v178_v20, %v179_v22  ;;  %171 = vst [vmem:[%s366_s2 + $0x20] sm:$0xff] %v46_v16  ;;  %v116_v35 = vsub.f32 %v190_v32, %v191_v33  ;;  %v193_v36 = vld [vmem:[%s364_s0 + $0x28] sm:$0xff]  ;;  %v199_v41 = vld [vmem:[%s364_s0 + $0x38] sm:$0xff] }
   0xa   :  { %v194_v37 = vld [vmem:[%s365_s1 + $0x28] sm:$0xff]  ;;  %177 = vst [vmem:[%s366_s2 + $0x30] sm:$0xff] %v66_v21  ;;  %v200_v42 = vld [vmem:[%s365_s1 + $0x38] sm:$0xff] }
   0xb   :  { %174 = vst [vmem:[%s366_s2 + $0x60] sm:$0xff] %v56_v17  ;;  %v196_v38 = vld [vmem:[%s364_s0 + $0x68] sm:$0xff]  ;;  %v126_v39 = vsub.f32 %v193_v36, %v194_v37  ;;  %v146_v44 = vsub.f32 %v199_v41, %v200_v42  ;;  %v202_v45 = vld [vmem:[%s364_s0 + $0x78] sm:$0xff] }
   0xc   :  { %v197_v40 = vld [vmem:[%s365_s1 + $0x68] sm:$0xff]  ;;  %180 = vst [vmem:[%s366_s2 + $0x70] sm:$0xff] %v76_v25  ;;  %v203_v46 = vld [vmem:[%s365_s1 + $0x78] sm:$0xff] }
   0xd   :  { %v136_v43 = vsub.f32 %v196_v38, %v197_v40  ;;  %183 = vst [vmem:[%s366_s2 + $0x8] sm:$0xff] %v86_v26  ;;  %v156_v47 = vsub.f32 %v202_v45, %v203_v46 }
   0xe   :  { %186 = vst [vmem:[%s366_s2 + $0x48] sm:$0xff] %v96_v30 }
   0xf   :  { %189 = vst [vmem:[%s366_s2 + $0x18] sm:$0xff] %v106_v34 }
  0x10   :  { %192 = vst [vmem:[%s366_s2 + $0x58] sm:$0xff] %v116_v35 }
  0x11   :  { %195 = vst [vmem:[%s366_s2 + $0x28] sm:$0xff] %v126_v39 }
  0x12   :  { %198 = vst [vmem:[%s366_s2 + $0x68] sm:$0xff] %v136_v43 }
  0x13   :  { %201 = vst [vmem:[%s366_s2 + $0x38] sm:$0xff] %v146_v44 }
  0x14   :  { %204 = vst [vmem:[%s366_s2 + $0x78] sm:$0xff] %v156_v47 }

// kernel: _lambda_.3
= control target key start
LH: loop header
LB: loop body
LE: loop exit
PB: predicated region body
PF: predicated region fallthrough
CT: control target
= control target key end

     0   :  { %v101_v20 = vmov 0   ;;  %s152_s0 = inlined_call_operand.vmem [shape: f32[2,8,256], index: 0, kind: input, shape index: {}]   ;;  %s153_s1 = inlined_call_operand.vmem [shape: f32[8,1], index: 1, kind: input, shape index: {}]   ;;  %s154_s2 = inlined_call_operand.vmem [shape: f32[8,1], index: 2, kind: input, shape index: {}]   ;;  %s155_s3 = inlined_call_operand.vmem [shape: f32[2,8,256], index: 3, kind: output, shape index: {}]  }
   0x1   :  { %v14_v0 = vld [vmem:[%s152_s0] sm:$0xff]  ;;  %v15_v1 = vld [vmem:[%s152_s0 + $0x8] sm:$0xff]  ;;  %v90_v3 = vld [vmem:[%s152_s0 + $0x10] sm:$0xff]  ;;  %97 = vset.pattern.permute.xlu2 %v101_v20  ;;  %98 = vset.pattern.permute.xlu0 %v101_v20 }
   0x2   :  { %v16_v2 = vadd.f32 %v15_v1, %v14_v0  ;;  %v91_v4 = vld [vmem:[%s152_s0 + $0x18] sm:$0xff]  ;;  %v56_v32 = vld [vmem:[%s153_s1] sm:$0xff] }
   0x3   :  { %v23_v5 = vadd.f32 %v91_v4, %v90_v3  ;;  %v58_v36 = vld [vmem:[%s154_s2] sm:$0xff] }
   0x4   :  { %17 = vadd.xlane.f32.xlu0 %v16_v2 }
   0xc   :  { %24 = vadd.xlane.f32.xlu0 %v23_v5 }
  0x77   :  { %v18_v6 = vpop.xlane.xlu0 %17 }
  0x7f   :  { %v25_v7 = vpop.xlane.xlu0 %24 }
  0x80   :  { %v26_v8 = vadd.f32 %v25_v7, %v18_v6 }
  0x82   :  { %v27_v9 = vmul.f32 0.001953125, %v26_v8 }
  0x84   :  { %v28_v10 = vsub.f32 %v14_v0, %v27_v9  ;;  %v29_v11 = vsub.f32 %v15_v1, %v27_v9  ;;  %v36_v15 = vsub.f32 %v90_v3, %v27_v9  ;;  %v37_v16 = vsub.f32 %v91_v4, %v27_v9 }
  0x86   :  { %v30_v12 = vmul.f32 %v28_v10, %v28_v10  ;;  %v31_v13 = vmul.f32 %v29_v11, %v29_v11  ;;  %v38_v17 = vmul.f32 %v36_v15, %v36_v15  ;;  %v39_v18 = vmul.f32 %v37_v16, %v37_v16 }
  0x88   :  { %v32_v14 = vadd.f32 %v31_v13, %v30_v12  ;;  %v40_v19 = vadd.f32 %v39_v18, %v38_v17 }
  0x8a   :  { %33 = vadd.xlane.f32.xlu1 %v32_v14 }
  0x92   :  { %41 = vadd.xlane.f32.xlu1 %v40_v19 }
  0xfd   :  { %v34_v21 = vpop.xlane.xlu1 %33 }
 0x105   :  { %v42_v22 = vpop.xlane.xlu1 %41 }
 0x106   :  { %v43_v23 = vadd.f32 %v42_v22, %v34_v21 }
 0x108   :  { %v44_v24 = vmul.f32 0.001953125, %v43_v23 }
 0x10a   :  { %v45_v25 = vadd.f32 1e-05, %v44_v24 }
 0x10c   :  { %99 = vrsqrt.f32 %v45_v25  ;;  %vm52_vm1 = vweird.f32 %v45_v25 }
 0x112   :  { %v100_v26 = vpop.eup %99 }
 0x113   :  { %v47_v27 = vmul.f32 %v100_v26, %v45_v25  ;;  %vm53_vm0 = vweird.f32 %v100_v26 }
 0x114   :  { %vm54_vm2 = vmor %vm52_vm1, %vm53_vm0 }
 0x115   :  { %v48_v28 = vmul.f32 %v100_v26, %v47_v27 }
 0x117   :  { %v49_v29 = vmul.f32 0.5, %v48_v28 }
 0x119   :  { %v50_v30 = vsub.f32 1.5, %v49_v29 }
 0x11b   :  { %v51_v31 = vmul.f32 %v100_v26, %v50_v30 }
 0x11d   :  { %v55_v33 = vsel %vm54_vm2, %v100_v26, %v51_v31 }
 0x11e   :  { %v57_v34 = vmul.f32 %v56_v32, %v55_v33 }
 0x120   :  { %63 = vperm.xlu2 %97, %v57_v34   ;;  %v59_v35 = vmul.f32 %v57_v34, %v27_v9 }
 0x122   :  { %v60_v37 = vsub.f32 %v58_v36, %v59_v35 }
 0x128   :  { %70 = vperm.xlu2 %97, %v60_v37  }
 0x17a   :  { %v64_v38 = vpop.permute.xlu2 %63 }
 0x17b   :  { %v66_v39 = vmul.f32 %v64_v38, %v14_v0  ;;  %v67_v40 = vmul.f32 %v64_v38, %v15_v1  ;;  %v79_v41 = vmul.f32 %v90_v3, %v64_v38  ;;  %v80_v42 = vmul.f32 %v91_v4, %v64_v38 }
 0x182   :  { %v71_v43 = vpop.permute.xlu2 %70 }
 0x183   :  { %v73_v44 = vadd.f32 %v71_v43, %v66_v39  ;;  %v74_v45 = vadd.f32 %v71_v43, %v67_v40  ;;  %v81_v46 = vadd.f32 %v79_v41, %v71_v43  ;;  %v82_v47 = vadd.f32 %v80_v42, %v71_v43 }
 0x185   :  { %75 = vst [vmem:[%s155_s3] sm:$0xff] %v73_v44 }
 0x186   :  { %76 = vst [vmem:[%s155_s3 + $0x8] sm:$0xff] %v74_v45 }
 0x187   :  { %94 = vst [vmem:[%s155_s3 + $0x10] sm:$0xff] %v81_v46 }
 0x188   :  { %95 = vst [vmem:[%s155_s3 + $0x18] sm:$0xff] %v82_v47 }

// kernel: _lambda_.2
= control target key start
LH: loop header
LB: loop body
LE: loop exit
PB: predicated region body
PF: predicated region fallthrough
CT: control target
= control target key end

     0   :  { %s1453_s18 = smov 0   ;;  %s1596_s0 = inlined_call_operand.vmem [shape: f32[2,4,256], index: 0, kind: input, shape index: {}]   ;;  %s1597_s1 = inlined_call_operand.vmem [shape: f32[2,4,256], index: 1, kind: input, shape index: {}]   ;;  %s1598_s2 = inlined_call_operand.vmem [shape: f32[4,4], index: 2, kind: input, shape index: {}]   ;;  %s1599_s3 = inlined_call_operand.vmem [shape: f32[9,8,4], index: 3, kind: input, shape index: {}]   ;;  %s1600_s4 = inlined_call_operand.vmem [shape: f32[2,256], index: 4, kind: input, shape index: {}]   ;;  %s1601_s5 = inlined_call_operand.vmem [shape: f32[2,8,256], index: 5, kind: output, shape index: {}]  }
   0x1 LB: > { %s1292_s19 = sadd.s32 4294967295, %s1404_s18   ;;  %p1296_p0 = scmp.ge.s32.totalorder %s1404_s18, 1  ;;  %s1404_s18 = sphi %s1453_s18, %s15_s18  }
   0x2   : > { %p197_p1 = scmp.lt.s32.totalorder %s1404_s18, 3 }
   0x4   : > { %p198_p2 = pnand %p1296_p0, %p197_p1 }
   0x5   : > { %p230_p3 = scmp.lt.s32.totalorder (!%p198_p2), %s1292_s19, 1  ;;  %s1409_s8 = smov (!%p198_p2), 2  }
   0x6   : > { %201 = sbr.rel (%p198_p2) target bundleno = 1459 (0x5b3), region = 40  ;;  %s1410_s9 = smov (!%p198_p2), 18  }
   0x7   : > { %s1411_s10 = smov (!%p198_p2), 16   ;;  %s1412_s11 = smov (!%p198_p2), 32  }
   0x8   : > { %s1413_s12 = smov (!%p198_p2), 34   ;;  %s1414_s13 = smov (!%p198_p2), 17  }
   0x9   : > { %s1415_s14 = smov (!%p198_p2), 127   ;;  %s1416_s15 = smov (!%p198_p2), 126  }
   0xa   : > { %s1417_s16 = smov (!%p198_p2), 112   ;;  %s1418_s17 = smov (!%p198_p2), 111  }
   0xb   : > { %v1406_v0 = vmov 0.0   ;;  %s1603_s19 = smov (!%p230_p3, %s1292_s19), 1  ;;  %v1407_v5 = vmov 0   ;;  %v267_v14 = vlaneseq  ;;  %vm325_vm3 = vcmask 1043456   ;;  %v247_v28 = vld [vmem:[%s1598_s2] sm:$0xf] }
   0xc   : > { %536 = vst [vmem:[#allocation2] sm:$0xff] %v1406_v0  ;;  %s1366_s20 = sshll.u32 %s1603_s19, 3  ;;  %v1408_v24 = vmov 1.0   ;;  %1308 = vmatpush.msk.msra.mxu2 %vm325_vm3, %v247_v28  ;;  %vm350_vm11 = vcmask 31744   ;;  %vm406_vm13 = vcmask 27648   ;;  %vm537_vm14 = vcmask 273408  }
   0xd   : > { %s234_s23 = scalar_lea.vmem %s1596_s0, %s1366_s20  ;;  %s239_s26 = scalar_lea.vmem %s1597_s1, %s1366_s20  ;;  %v268_v17 = vshrl.u32 %v267_v14, 7  ;;  %v401_v47 = vand.u32 127, %v267_v14  ;;  %538 = vst.msk [vmem:[#allocation2 + $0x8] sm:$0xf] %vm537_vm14, %v1406_v0  ;;  %vm547_vm15 = vcmask 1043592   ;;  %vm943_vm14 = vcmask 900096  }
   0xe   : > { %v245_v1 = vld [vmem:[%s234_s23] sm:$0xff]  ;;  %s1419_s20 = smov 110   ;;  %s1420_s21 = smov 96  }
   0xf   : > { %v1471_v2 = vld [vmem:[%s239_s26] sm:$0xff]  ;;  %v249_v3 = vrot.slane %v245_v1, 7  ;;  %vm402_vm12 = vcmp.eq.s32.totalorder %v268_v17, %v401_v47  ;;  %s1421_s22 = smov 94   ;;  %s1422_s23 = smov 95  }
  0x10   : > { %280 = vst [vmem:[#allocation1] ss:$2 sm:$0xff] %v1471_v2  ;;  %v1312_v48 = vsel %vm402_vm12, 1.0, %v1406_v0  ;;  %vm715_vm12 = vcmask 1031168  }
  0x11   : > { %vm251_vm0 = vcmp.gt.f32.partialorder %v245_v1, %v249_v3 }
  0x12   : > { %v252_v4 = vsel %vm251_vm0, %v245_v1, %v249_v3  ;;  %v253_v6 = vsel %vm251_vm0, 1, %v1407_v5  ;;  %vm548_vm0 = vcmask 1047556  }
  0x13   : > { %v255_v7 = vrot.slane %v252_v4, 7  ;;  %v259_v8 = vrot.slane %v253_v6, 7 }
  0x15   : > { %vm257_vm1 = vcmp.gt.f32.partialorder %v245_v1, %v255_v7 }
  0x16   : > { %v258_v9 = vsel %vm257_vm1, %v245_v1, %v255_v7  ;;  %v260_v10 = vsel %vm257_vm1, 2, %v259_v8  ;;  %v1328_v7 = vld [vmem:[%s1600_s4 + $0x1] ss:$2 sm:$0x3]  ;;  %vm543_vm1 = vcmask 138240  }
  0x17   : > { %v281_v11 = vld.sshfl [vmem:[#allocation1] sm:$0xff pattern:$0x75316420]  ;;  %v262_v12 = vrot.slane %v258_v9, 7  ;;  %v265_v13 = vrot.slane %v260_v10, 7  ;;  %v686_v9 = vperm.slane %v1328_v7, 0 }
  0x18   : > { %300 = vmatpush.xpose.msra.mxu0 %v281_v11  ;;  %v282_v15 = vld.sshfl [vmem:[#allocation1 + $0x8] sm:$0xff pattern:$0x75316420]  ;;  %v554_v8 = vld [vmem:[%s1600_s4] ss:$2 sm:$0x3] }
  0x19   : > { %320 = vmatpush.xpose.msra.mxu1 %v282_v15  ;;  %vm264_vm2 = vcmp.gt.f32.partialorder %v245_v1, %v262_v12  ;;  %v422_v1 = vsub.f32 1.0, %v1312_v48  ;;  %v687_v10 = vperm.slane %v1328_v7, 1  ;;  %v557_v12 = vperm.slane %v554_v8, 1 }
  0x1a   : > { %v266_v16 = vsel %vm264_vm2, 3, %v265_v13  ;;  %v556_v14 = vperm.slane %v554_v8, 0  ;;  %vm551_vm2 = vcmask 134144  }
  0x1b   : > { %v269_v18 = vperm.slane %v266_v16, 3  ;;  %v270_v19 = vperm.slane %v266_v16, 7  ;;  %v688_v11 = vrot.slane %v687_v10, 4  ;;  %v558_v15 = vrot.slane %v557_v12, 4 }
  0x1d   : > { %v271_v20 = vperm.slane %v269_v18, 3  ;;  %v272_v21 = vperm.slane %v270_v19, 3  ;;  %v689_v13 = vsel %vm325_vm3, %v686_v9, %v688_v11  ;;  %v559_v16 = vsel %vm325_vm3, %v556_v14, %v558_v15 }
  0x1e   : > { %690 = vrot.lane.b32.xlu2 %v689_v13, %s1409_s8 }
  0x1f   : > { %vm273_vm4 = vcmp.eq.s32.totalorder %v268_v17, %v271_v20  ;;  %vm274_vm5 = vcmp.eq.s32.totalorder %v268_v17, %v272_v21 }
  0x20   : > { %v1303_v22 = vsel %vm273_vm4, 1.0, %v1406_v0  ;;  %v1304_v23 = vsel %vm274_vm5, 1.0, %v1406_v0  ;;  %1305 = vmatmul.msk.f32.vlgmr.msra.gmra.mxu0 %vm273_vm4, %v1408_v24  ;;  %1306 = vmatmul.msk.f32.vlgmr.msra.gmra.mxu1 %vm274_vm5, %v1408_v24  ;;  %vm549_vm4 = vmor %vm548_vm0, %vm547_vm15  ;;  %vm693_vm5 = vcmask 15360   ;;  %vm864_vm15 = vcmask 908288  }
  0x21   : > { %v326_v25 = vsel %vm325_vm3, %v1303_v22, 0.0  ;;  %v327_v26 = vsel %vm325_vm3, %v1304_v23, 0.0  ;;  %1315 = vmatpush.msk.msrb.mxu0 %vm325_vm3, %v1303_v22  ;;  %1317 = vmatpush.msk.msrb.mxu1 %vm325_vm3, %v1304_v23  ;;  %vm1022_vm0 = vcmask 785408  }
  0x22   : > { %v328_v27 = vadd.f32 %v327_v26, %v326_v25 }
  0x24   : > { %329 = vadd.xlane.f32.xlu0 %v328_v27 }
  0x26   : > { %769 = vrot.lane.b32.xlu2 %v559_v16, %s1411_s10 }
  0x2e   : > { %997 = vrot.lane.b32.xlu2 %v559_v16, %s1412_s11 }
  0x36   : > { %1146 = vrot.lane.b32.xlu2 %v689_v13, %s1413_s12 }
  0x78   : > { %v691_v26 = vpop.permute.xlu2 %690 }
  0x79   : > { %v692_v27 = vrot.slane %v691_v26, 4 }
  0x97   : > { %v330_v29 = vpop.xlane.xlu0 %329 }
  0x98   : > { %vm331_vm6 = vcmp.eq.f32.partialorder %v330_v29, 0.0 }
  0x99   : > { %v1307_v30 = vsel %vm331_vm6, 1.0, %v1406_v0  ;;  %vm772_vm6 = vcmask 130048  }
  0x9a   : > { %v334_v31 = vadd.f32 %v1307_v30, %v330_v29 }
  0x9c   : > { %1394 = vrcp.f32 %v334_v31  ;;  %v346_v37 = vand.u32 2147483648, %v334_v31  ;;  %v344_v39 = vand.u32 2147483647, %v334_v31  ;;  %vm340_vm8 = vweird.f32 %v334_v31 }
  0x9d   : > { %v302_v35 = vpop.f32.mrf.mxu0  ;;  %v322_v36 = vpop.f32.mrf.mxu1 }
  0x9e   : > { %v323_v40 = vadd.f32 %v322_v36, %v302_v35  ;;  %v347_v42 = vor.u32 1.1754944e-38, %v346_v37  ;;  %vm345_vm10 = vcmp.eq.f32.partialorder %v344_v39, 8.507059e+37 }
  0xa2   : > { %v1395_v32 = vpop.eup %1394 }
  0xa3   : > { %v336_v33 = vmul.f32 %v1395_v32, %v334_v31  ;;  %vm341_vm7 = vweird.f32 %v1395_v32 }
  0xa4   : > { %vm342_vm9 = vmor %vm340_vm8, %vm341_vm7  ;;  %vm921_vm7 = vcmask 146432   ;;  %vm1000_vm8 = vcmask 261120  }
  0xa5   : > { %v337_v34 = vsub.f32 1.0, %v336_v33  ;;  %v770_v33 = vpop.permute.xlu2 %769 }
  0xa6   : > { %v771_v35 = vrot.slane %v770_v33, 4 }
  0xa7   : > { %v338_v38 = vmul.f32 %v1395_v32, %v337_v34  ;;  %v694_v34 = vsel %vm693_vm5, %v692_v27, %v691_v26 }
  0xa9   : > { %v339_v41 = vadd.f32 %v1395_v32, %v338_v38 }
  0xab   : > { %v343_v43 = vsel %vm342_vm9, %v1395_v32, %v339_v41  ;;  %vm1149_vm9 = vcmask 277504  }
  0xac   : > { %v348_v44 = vsel %vm345_vm10, %v347_v42, %v343_v43  ;;  %v773_v42 = vsel %vm772_vm6, %v771_v35, %v770_v33  ;;  %vm580_vm10 = vcmask 1039360  }
  0xad   : > { %v349_v45 = vmul.f32 %v348_v44, %v323_v40 }
  0xaf   : > { %1309 = vmatmul.msk.f32.vlgmr.msra.gmra.mxu2 %vm350_vm11, %v349_v45  ;;  %1310 = vmatpush.xpose.msk.msra.mxu3 %vm350_vm11, %v349_v45 }
  0xb0   : > { %1313 = vmatpush.msk.msrb.mxu2 %vm325_vm3, %v349_v45 }
 0x132   : > { %v374_v46 = vpop.f32.mrf.mxu2 }
 0x133   : > { %1311 = vmatmul.msk.f32.vlgmr.msra.gmra.mxu3 %vm350_vm11, %v374_v46 }
 0x1b6   : > { %v397_v49 = vpop.f32.mrf.mxu3 }
 0x1b7   : > { %v405_v50 = vmul.f32 %v1312_v48, %v397_v49  ;;  %v417_v59 = vmul.f32 2.0, %v397_v49 }
 0x1b9   : > { %v407_v51 = vsel %vm406_vm13, %v405_v50, 0.0  ;;  %vm794_vm13 = vcmask 916480  }
 0x1ba   : > { %408 = vadd.xlane.f32.xlu0 %v407_v51  ;;  %v410_v52 = vrot.slane %v407_v51, 4 }
 0x1bc   : > { %v411_v53 = vadd.f32 %v410_v52, %v407_v51 }
 0x1be   : > { %v412_v54 = vrot.slane %v411_v53, 2 }
 0x1c0   : > { %v413_v55 = vadd.f32 %v412_v54, %v411_v53 }
 0x1c2   : > { %v414_v56 = vrot.slane %v413_v55, 1 }
 0x1c4   : > { %v415_v57 = vadd.f32 %v414_v56, %v413_v55  ;;  %v998_v55 = vpop.permute.xlu2 %997 }
 0x1c5   : > { %v999_v56 = vrot.slane %v998_v55, 4 }
 0x1cc   : > { %v1147_v7 = vpop.permute.xlu2 %1146 }
 0x1cd   : > { %v1148_v9 = vrot.slane %v1147_v7, 4 }
 0x1ce   : > { %918 = vrot.lane.b32.xlu0 %v689_v13, %s1410_s9 }
 0x1cf   : > { %v1150_v15 = vsel %vm1149_vm9, %v1148_v9, %v1147_v7 }
 0x22d   : > { %v409_v58 = vpop.xlane.xlu0 %408 }
 0x22e   : > { %v416_v60 = vadd.f32 %v415_v57, %v409_v58 }
 0x230   : > { %v418_v61 = vsub.f32 %v416_v60, %v417_v59 }
 0x232   : > { %v419_v62 = vsub.f32 0.0, %v418_v61 }
 0x234   : > { %v420_v63 = vmul.f32 1.442695, %v419_v62 }
 0x236   : > { %1396 = vpow2.f32 %v420_v63 }
 0x23c   : > { %v1397_v3 = vpop.eup %1396 }
 0x23d   : > { %v423_v4 = vmul.f32 %v1397_v3, %v422_v1  ;;  %v1001_v1 = vsel %vm1000_vm8, %v999_v56, %v998_v55 }
 0x23f   : > { %1314 = vmatmul.msk.f32.vlgmr.msrb.gmra.mxu2 %vm350_vm11, %v423_v4 }
 0x240   : > { %v919_v47 = vpop.permute.xlu0 %918 }
 0x241   : > { %v920_v49 = vrot.slane %v919_v47, 4 }
 0x243   : > { %v922_v57 = vsel %vm921_vm7, %v920_v49, %v919_v47  ;;  %v1339_v47 = vld [vmem:[%s1599_s3 + $0x20] sm:$0xff] }
 0x2c2   : > { %v446_v5 = vpop.f32.mrf.mxu2 }
 0x2c3   : > { %449 = vxpose.xlu1.b32.start.end [1/1] (short) (narrow) %v446_v5, 8 }
 0x367   : > { %v465_v6 = vpop.trf.xlu1 }
 0x368   : > { %1316 = vmatmul.msk.f32.vlgmr.msrb.gmra.mxu0 %vm350_vm11, %v465_v6  ;;  %1318 = vmatmul.msk.f32.vlgmr.msrb.gmra.mxu1 %vm350_vm11, %v465_v6 }
 0x3e5   : > { %v527_v17 = vpop.f32.mrf.mxu1  ;;  %v507_v19 = vpop.f32.mrf.mxu0 }
 0x3e6   : > { %v532_v18 = vrot.slane %v527_v17, 4 }
 0x3e8   : > { %v533_v20 = vsel %vm325_vm3, %v507_v19, %v532_v18 }
 0x3e9   : > { %v535_v21 = vadd.f32 %v533_v20, %v1471_v2 }
 0x3eb   : > { %540 = vrot.lane.b32.xlu1 %v535_v21, %s1414_s13 }
 0x45d   : > { %v541_v22 = vpop.permute.xlu1 %540 }
 0x45e   : > { %v542_v23 = vrot.slane %v541_v22, 4 }
 0x460   : > { %v544_v24 = vsel %vm543_vm1, %v542_v23, %v541_v22  ;;  %552 = vst.msk [vmem:[#allocation2 + $0x8] sm:$0xf] %vm551_vm2, %v542_v23  ;;  %vm1171_vm1 = vcmask 769024   ;;  %vm1092_vm2 = vcmask 777216  }
 0x461   : > { %550 = vst.msk [vmem:[#allocation2] sm:$0xff] %vm549_vm4, %v544_v24 }
 0x467   : > { %v563_v2 = vld [vmem:[#allocation2 + $0x8] sm:$0xf] }
 0x468   : > { %v1504_v25 = vld [vmem:[#allocation2] sm:$0xff]  ;;  %570 = vst [vmem:[#allocation1 + $0x10] ss:$2 sm:$0xff] %v563_v2  ;;  %v682_v28 = vld [vmem:[#allocation2 + $0x8] sm:$0xf] }
 0x469   : > { %568 = vst [vmem:[#allocation1] ss:$2 sm:$0xff] %v1504_v25  ;;  %v561_v0 = vmul.f32 %v559_v16, %v1504_v25  ;;  %v698_v29 = vmul.f32 %v692_v27, %v682_v28  ;;  %v768_v36 = vld [vmem:[#allocation2 + $0x8] sm:$0xf]  ;;  %v697_v37 = vmul.f32 %v694_v34, %v1504_v25  ;;  %v776_v43 = vmul.f32 %v773_v42, %v1504_v25  ;;  %v1319_v2 = vld [vmem:[%s1599_s3 + $0x8] sm:$0xff] }
 0x46a   : > { %v777_v40 = vmul.f32 %v771_v35, %v768_v36  ;;  %v847_v44 = vld [vmem:[#allocation2 + $0x8] sm:$0xf]  ;;  %v925_v59 = vmul.f32 %v922_v57, %v1504_v25  ;;  %v1004_v3 = vmul.f32 %v1001_v1, %v1504_v25  ;;  %v1153_v16 = vmul.f32 %v1150_v15, %v1504_v25  ;;  %v1334_v35 = vld [vmem:[%s1599_s3 + $0x18] sm:$0xff]  ;;  %v1344_v42 = vld [vmem:[%s1599_s3 + $0x28] sm:$0xff] }
 0x46b   : > { %v917_v50 = vld [vmem:[#allocation2 + $0x8] sm:$0xf] }
 0x46c   : > { %v926_v51 = vmul.f32 %v920_v49, %v917_v50  ;;  %v996_v58 = vld [vmem:[#allocation2 + $0x8] sm:$0xf] }
 0x46d   : > { %v1005_v60 = vmul.f32 %v999_v56, %v996_v58  ;;  %v1075_v4 = vld [vmem:[#allocation2 + $0x8] sm:$0xf] }
 0x46e   : > { %v1145_v10 = vld [vmem:[#allocation2 + $0x8] sm:$0xf] }
 0x46f   : > { %v573_v32 = vld.sshfl [vmem:[#allocation1 + $0x10] sm:$0xff pattern:$0x75316420]  ;;  %v1154_v11 = vmul.f32 %v1148_v9, %v1145_v10 }
 0x470   : > { %v572_v30 = vld.sshfl [vmem:[#allocation1 + $0x8] sm:$0xff pattern:$0x75316420]  ;;  %v571_v31 = vld.sshfl [vmem:[#allocation1] sm:$0xff pattern:$0x75316420]  ;;  %578 = vrot.lane.b32.xlu2 %v573_v32, %s1415_s14 }
 0x471   : > { %576 = vrot.lane.b32.xlu0 %v572_v30, %s1415_s14  ;;  %631 = vst [vmem:[#allocation1] ss:$2 sm:$0xff] %v561_v0  ;;  %v562_v0 = vld [vmem:[%s1599_s3] sm:$0xff]  ;;  %v1349_v56 = vld [vmem:[%s1599_s3 + $0x30] sm:$0xff] }
 0x472   : > { %705 = vst [vmem:[#allocation1 + $0x10] ss:$2 sm:$0xff] %v698_v29 }
 0x478   : > { %v632_v38 = vld.sshfl [vmem:[#allocation1] sm:$0xff pattern:$0x75316420]  ;;  %v633_v39 = vld.sshfl [vmem:[#allocation1 + $0x8] sm:$0xff pattern:$0x75316420]  ;;  %574 = vrot.lane.b32.xlu2 %v571_v31, %s1415_s14 }
 0x479   : > { %v708_v41 = vld.sshfl [vmem:[#allocation1 + $0x10] sm:$0xff pattern:$0x75316420]  ;;  %1324 = vmatpush.msk.msra.mxu0 %vm325_vm3, %v632_v38  ;;  %1326 = vmatpush.msk.msra.mxu1 %vm325_vm3, %v633_v39  ;;  %703 = vst [vmem:[#allocation1] ss:$2 sm:$0xff] %v697_v37 }
 0x47a   : > { %713 = vrot.lane.b32.xlu0 %v708_v41, %s1416_s15  ;;  %784 = vst [vmem:[#allocation1 + $0x10] ss:$2 sm:$0xff] %v777_v40  ;;  %1327 = vmatmul.msk.f32.vlgmr.msra.gmra.mxu1 %vm350_vm11, %v562_v0  ;;  %v1329_v31 = vld [vmem:[%s1599_s3 + $0x10] sm:$0xff] }
 0x47b   : > { %1325 = vmatmul.msk.f32.vlgmr.msra.gmra.mxu0 %vm350_vm11, %v562_v0 }
 0x480   : > { %v707_v45 = vld.sshfl [vmem:[#allocation1 + $0x8] sm:$0xff pattern:$0x75316420]  ;;  %v706_v46 = vld.sshfl [vmem:[#allocation1] sm:$0xff pattern:$0x75316420] }
 0x481   : > { %v787_v48 = vld.sshfl [vmem:[#allocation1 + $0x10] sm:$0xff pattern:$0x75316420]  ;;  %782 = vst [vmem:[#allocation1] ss:$2 sm:$0xff] %v776_v43  ;;  %711 = vrot.lane.b32.xlu2 %v707_v45, %s1416_s15 }
 0x482   : > { %854 = vst [vmem:[#allocation1 + $0x10] ss:$2 sm:$0xff] %v847_v44  ;;  %792 = vrot.lane.b32.xlu0 %v787_v48, %s1417_s16 }
 0x488   : > { %v786_v52 = vld.sshfl [vmem:[#allocation1 + $0x8] sm:$0xff pattern:$0x75316420]  ;;  %v785_v53 = vld.sshfl [vmem:[#allocation1] sm:$0xff pattern:$0x75316420] }
 0x489   : > { %v857_v54 = vld.sshfl [vmem:[#allocation1 + $0x10] sm:$0xff pattern:$0x75316420]  ;;  %852 = vst [vmem:[#allocation1] ss:$2 sm:$0xff] %v1504_v25 }
 0x48a   : > { %933 = vst [vmem:[#allocation1 + $0x10] ss:$2 sm:$0xff] %v926_v51  ;;  %862 = vrot.lane.b32.xlu2 %v857_v54, %s1418_s17  ;;  %709 = vrot.lane.b32.xlu0 %v706_v46, %s1416_s15 }
 0x490   : > { %v856_v61 = vld.sshfl [vmem:[#allocation1 + $0x8] sm:$0xff pattern:$0x75316420]  ;;  %v855_v62 = vld.sshfl [vmem:[#allocation1] sm:$0xff pattern:$0x75316420] }
 0x491   : > { %v936_v63 = vld.sshfl [vmem:[#allocation1 + $0x10] sm:$0xff pattern:$0x75316420]  ;;  %931 = vst [vmem:[#allocation1] ss:$2 sm:$0xff] %v925_v59 }
 0x492   : > { %941 = vrot.lane.b32.xlu1 %v936_v63, %s1419_s20  ;;  %1012 = vst [vmem:[#allocation1 + $0x10] ss:$2 sm:$0xff] %v1005_v60  ;;  %790 = vrot.lane.b32.xlu2 %v786_v52, %s1417_s16 }
 0x493   : > { %788 = vrot.lane.b32.xlu0 %v785_v53, %s1417_s16 }
 0x498   : > { %v934_v5 = vld.sshfl [vmem:[#allocation1] sm:$0xff pattern:$0x75316420]  ;;  %v935_v6 = vld.sshfl [vmem:[#allocation1 + $0x8] sm:$0xff pattern:$0x75316420] }
 0x499   : > { %v1015_v8 = vld.sshfl [vmem:[#allocation1 + $0x10] sm:$0xff pattern:$0x75316420]  ;;  %1010 = vst [vmem:[#allocation1] ss:$2 sm:$0xff] %v1004_v3  ;;  %v1359_v3 = vld [vmem:[%s1599_s3 + $0x40] sm:$0xff] }
 0x49a   : > { %858 = vrot.lane.b32.xlu2 %v855_v62, %s1418_s17  ;;  %1082 = vst [vmem:[#allocation1 + $0x10] ss:$2 sm:$0xff] %v1075_v4  ;;  %v1354_v62 = vld [vmem:[%s1599_s3 + $0x38] sm:$0xff] }
 0x49b   : > { %860 = vrot.lane.b32.xlu0 %v856_v61, %s1418_s17  ;;  %s1368_s17 = sshll.u32 %s1603_s19, 4 }
 0x4a0   : > { %v1014_v12 = vld.sshfl [vmem:[#allocation1 + $0x8] sm:$0xff pattern:$0x75316420]  ;;  %v1013_v13 = vld.sshfl [vmem:[#allocation1] sm:$0xff pattern:$0x75316420] }
 0x4a1   : > { %v1085_v14 = vld.sshfl [vmem:[#allocation1 + $0x10] sm:$0xff pattern:$0x75316420]  ;;  %1080 = vst [vmem:[#allocation1] ss:$2 sm:$0xff] %v1504_v25 }
 0x4a2   : > { %1161 = vst [vmem:[#allocation1 + $0x10] ss:$2 sm:$0xff] %v1154_v11  ;;  %1020 = vrot.lane.b32.xlu2 %v1015_v8, %s1420_s21 }
 0x4a3   : > { %937 = vrot.lane.b32.xlu0 %v934_v5, %s1419_s20 }
 0x4a8   : > { %v1083_v17 = vld.sshfl [vmem:[#allocation1] sm:$0xff pattern:$0x75316420]  ;;  %v1084_v18 = vld.sshfl [vmem:[#allocation1 + $0x8] sm:$0xff pattern:$0x75316420] }
 0x4a9   : > { %v1164_v19 = vld.sshfl [vmem:[#allocation1 + $0x10] sm:$0xff pattern:$0x75316420]  ;;  %1159 = vst [vmem:[#allocation1] ss:$2 sm:$0xff] %v1153_v16 }
 0x4aa   : > { %1169 = vrot.lane.b32.xlu1 %v1164_v19, %s1421_s22  ;;  %939 = vrot.lane.b32.xlu2 %v935_v6, %s1419_s20 }
 0x4ab   : > { %1018 = vrot.lane.b32.xlu0 %v1014_v12, %s1420_s21 }
 0x4b0   : > { %v1162_v20 = vld.sshfl [vmem:[#allocation1] sm:$0xff pattern:$0x75316420]  ;;  %v1163_v21 = vld.sshfl [vmem:[#allocation1 + $0x8] sm:$0xff pattern:$0x75316420] }
 0x4b2   : > { %1090 = vrot.lane.b32.xlu1 %v1085_v14, %s1422_s23  ;;  %1016 = vrot.lane.b32.xlu2 %v1013_v13, %s1420_s21 }
 0x4b3   : > { %1165 = vrot.lane.b32.xlu0 %v1162_v20, %s1421_s22 }
 0x4ba   : > { %1167 = vrot.lane.b32.xlu2 %v1163_v21, %s1421_s22  ;;  %s244_s22 = scalar_lea.vmem %s1601_s5, %s1368_s17 }
 0x4bb   : > { %1086 = vrot.lane.b32.xlu0 %v1083_v17, %s1422_s23 }
 0x4c2   : > { %1088 = vrot.lane.b32.xlu2 %v1084_v18, %s1422_s23 }
 0x4ca   : > { %v579_v22 = vpop.permute.xlu2 %578 }
 0x4d2   : > { %v575_v23 = vpop.permute.xlu2 %574 }
 0x4db   : > { %v712_v24 = vpop.permute.xlu2 %711 }
 0x4e3   : > { %v577_v25 = vpop.permute.xlu0 %576 }
 0x4e4   : > { %v582_v26 = vsel %vm580_vm10, %v577_v25, %v579_v22  ;;  %v863_v27 = vpop.permute.xlu2 %862  ;;  %v581_v28 = vsel %vm580_vm10, %v575_v23, %v577_v25 }
 0x4e5   : > { %1320 = vmatpush.msk.msrb.mxu3 %vm325_vm3, %v581_v28  ;;  %1322 = vmatpush.msk.msra.mxu2 %vm325_vm3, %v582_v26 }
 0x4e6   : > { %1321 = vmatmul.msk.f32.vlgmr.msrb.gmra.mxu3 %vm350_vm11, %v1319_v2  ;;  %1323 = vmatmul.msk.f32.vlgmr.msra.gmra.mxu2 %vm350_vm11, %v1319_v2 }
 0x4ec   : > { %v714_v29 = vpop.permute.xlu0 %713  ;;  %v791_v30 = vpop.permute.xlu2 %790 }
 0x4ed   : > { %v717_v32 = vsel %vm715_vm12, %v712_v24, %v714_v29 }
 0x4ee   : > { %1332 = vmatpush.msk.msrb.mxu2 %vm325_vm3, %v717_v32 }
 0x4ef   : > { %1333 = vmatmul.msk.f32.vlgmr.msrb.gmra.mxu2 %vm350_vm11, %v1329_v31 }
 0x4f4   : > { %v793_v33 = vpop.permute.xlu0 %792  ;;  %v859_v34 = vpop.permute.xlu2 %858 }
 0x4f5   : > { %v796_v36 = vsel %vm794_vm13, %v791_v30, %v793_v33 }
 0x4f6   : > { %1337 = vmatpush.msk.msrb.mxu1 %vm325_vm3, %v796_v36 }
 0x4f7   : > { %1338 = vmatmul.msk.f32.vlgmr.msrb.gmra.mxu1 %vm350_vm11, %v1334_v35  ;;  %v678_v9 = vpop.f32.mrf.mxu1 }
 0x4f8   : > { %v658_v10 = vpop.f32.mrf.mxu0 }
 0x4fc   : > { %v710_v37 = vpop.permute.xlu0 %709  ;;  %v1021_v38 = vpop.permute.xlu2 %1020 }
 0x4fd   : > { %v716_v39 = vsel %vm715_vm12, %v710_v37, %v712_v24 }
 0x4fe   : > { %1330 = vmatpush.msk.msra.mxu3 %vm325_vm3, %v716_v39 }
 0x4ff   : > { %1331 = vmatmul.msk.f32.vlgmr.msra.gmra.mxu3 %vm350_vm11, %v1329_v31 }
 0x504   : > { %v942_v40 = vpop.permute.xlu1 %941  ;;  %v940_v41 = vpop.permute.xlu2 %939 }
 0x505   : > { %v789_v43 = vpop.permute.xlu0 %788  ;;  %v945_v44 = vsel %vm943_vm14, %v940_v41, %v942_v40 }
 0x506   : > { %v795_v45 = vsel %vm794_vm13, %v789_v43, %v791_v30  ;;  %1347 = vmatpush.msk.msra.mxu1 %vm325_vm3, %v945_v44 }
 0x507   : > { %1335 = vmatpush.msk.msrb.mxu0 %vm325_vm3, %v795_v45  ;;  %1348 = vmatmul.msk.f32.vlgmr.msra.gmra.mxu1 %vm350_vm11, %v1344_v42 }
 0x508   : > { %1336 = vmatmul.msk.f32.vlgmr.msrb.gmra.mxu0 %vm350_vm11, %v1334_v35 }
 0x50c   : > { %v1017_v50 = vpop.permute.xlu2 %1016 }
 0x50d   : > { %v861_v46 = vpop.permute.xlu0 %860 }
 0x50e   : > { %v865_v48 = vsel %vm864_vm15, %v859_v34, %v861_v46  ;;  %v866_v49 = vsel %vm864_vm15, %v861_v46, %v863_v27 }
 0x50f   : > { %1340 = vmatpush.msk.msrb.mxu3 %vm325_vm3, %v865_v48  ;;  %1342 = vmatpush.msk.msra.mxu2 %vm325_vm3, %v866_v49 }
 0x510   : > { %1341 = vmatmul.msk.f32.vlgmr.msrb.gmra.mxu3 %vm350_vm11, %v1339_v47  ;;  %1343 = vmatmul.msk.f32.vlgmr.msra.gmra.mxu2 %vm350_vm11, %v1339_v47 }
 0x514   : > { %v1168_v53 = vpop.permute.xlu2 %1167 }
 0x515   : > { %v938_v51 = vpop.permute.xlu0 %937 }
 0x516   : > { %v944_v52 = vsel %vm943_vm14, %v938_v51, %v940_v41 }
 0x517   : > { %1345 = vmatpush.msk.msra.mxu0 %vm325_vm3, %v944_v52 }
 0x518   : > { %1346 = vmatmul.msk.f32.vlgmr.msra.gmra.mxu0 %vm350_vm11, %v1344_v42 }
 0x51c   : > { %v1170_v54 = vpop.permute.xlu1 %1169  ;;  %v1089_v60 = vpop.permute.xlu2 %1088 }
 0x51d   : > { %v1019_v55 = vpop.permute.xlu0 %1018  ;;  %v1173_v59 = vsel %vm1171_vm1, %v1168_v53, %v1170_v54 }
 0x51e   : > { %v1023_v57 = vsel %vm1022_vm0, %v1017_v50, %v1019_v55  ;;  %v1024_v58 = vsel %vm1022_vm0, %v1019_v55, %v1021_v38 }
 0x51f   : > { %1350 = vmatpush.msk.msra.mxu3 %vm325_vm3, %v1023_v57  ;;  %1352 = vmatpush.msk.msrb.mxu2 %vm325_vm3, %v1024_v58 }
 0x520   : > { %1351 = vmatmul.msk.f32.vlgmr.msra.gmra.mxu3 %vm350_vm11, %v1349_v56  ;;  %1353 = vmatmul.msk.f32.vlgmr.msrb.gmra.mxu2 %vm350_vm11, %v1349_v56 }
 0x521   : > { %1362 = vmatpush.msk.msra.mxu2 %vm325_vm3, %v1173_v59 }
 0x524   : > { %v1091_v61 = vpop.permute.xlu1 %1090 }
 0x525   : > { %v1094_v63 = vsel %vm1092_vm2, %v1089_v60, %v1091_v61  ;;  %v1166_v1 = vpop.permute.xlu0 %1165 }
 0x526   : > { %v1172_v4 = vsel %vm1171_vm1, %v1166_v1, %v1168_v53  ;;  %1357 = vmatpush.msk.msrb.mxu1 %vm325_vm3, %v1094_v63 }
 0x527   : > { %1360 = vmatpush.msk.msrb.mxu3 %vm325_vm3, %v1172_v4  ;;  %1358 = vmatmul.msk.f32.vlgmr.msrb.gmra.mxu1 %vm350_vm11, %v1354_v62 }
 0x528   : > { %1363 = vmatmul.msk.f32.vlgmr.msra.gmra.mxu2 %vm350_vm11, %v1359_v3  ;;  %1361 = vmatmul.msk.f32.vlgmr.msrb.gmra.mxu3 %vm350_vm11, %v1359_v3 }
 0x52d   : > { %v1087_v5 = vpop.permute.xlu0 %1086 }
 0x52e   : > { %v1093_v6 = vsel %vm1092_vm2, %v1087_v5, %v1089_v60 }
 0x52f   : > { %1355 = vmatpush.msk.msrb.mxu0 %vm325_vm3, %v1093_v6 }
 0x530   : > { %1356 = vmatmul.msk.f32.vlgmr.msrb.gmra.mxu0 %vm350_vm11, %v1354_v62 }
 0x569   : > { %v627_v7 = vpop.f32.mrf.mxu2  ;;  %v607_v8 = vpop.f32.mrf.mxu3 }
 0x56a   : > { %v679_v13 = vadd.f32 %v678_v9, %v627_v7  ;;  %v659_v16 = vadd.f32 %v658_v10, %v607_v8 }
 0x572   : > { %v762_v11 = vpop.f32.mrf.mxu2 }
 0x573   : > { %v766_v15 = vadd.f32 %v762_v11, %v679_v13 }
 0x574   : > { %v841_v14 = vpop.f32.mrf.mxu1 }
 0x575   : > { %v845_v19 = vadd.f32 %v841_v14, %v766_v15 }
 0x582   : > { %v742_v12 = vpop.f32.mrf.mxu3 }
 0x583   : > { %v765_v21 = vadd.f32 %v742_v12, %v659_v16 }
 0x584   : > { %v990_v22 = vpop.f32.mrf.mxu1 }
 0x585   : > { %v821_v17 = vpop.f32.mrf.mxu0 }
 0x586   : > { %v844_v24 = vadd.f32 %v821_v17, %v765_v21 }
 0x593   : > { %v911_v18 = vpop.f32.mrf.mxu2  ;;  %v891_v20 = vpop.f32.mrf.mxu3 }
 0x594   : > { %v915_v23 = vadd.f32 %v911_v18, %v845_v19  ;;  %v914_v28 = vadd.f32 %v891_v20, %v844_v24 }
 0x595   : > { %v970_v26 = vpop.f32.mrf.mxu0 }
 0x596   : > { %v994_v2 = vadd.f32 %v990_v22, %v915_v23  ;;  %v993_v30 = vadd.f32 %v970_v26, %v914_v28 }
 0x5a3   : > { %v1069_v25 = vpop.f32.mrf.mxu2  ;;  %v1049_v27 = vpop.f32.mrf.mxu3 }
 0x5a4   : > { %v1073_v0 = vadd.f32 %v1069_v25, %v994_v2  ;;  %v1139_v29 = vpop.f32.mrf.mxu1  ;;  %v1072_v33 = vadd.f32 %v1049_v27, %v993_v30 }
 0x5a6   : > { %v1143_v31 = vadd.f32 %v1139_v29, %v1073_v0 }
 0x5ab   : > { %v1218_v32 = vpop.f32.mrf.mxu2  ;;  %v1198_v36 = vpop.f32.mrf.mxu3 }
 0x5ac   : > { %v1222_v34 = vadd.f32 %v1218_v32, %v1143_v31 }
 0x5ad   : > { %v1119_v35 = vpop.f32.mrf.mxu0 }
 0x5ae   : > { %1224 = vst [vmem:[%s244_s22 + $0x8] sm:$0xff] %v1222_v34  ;;  %v1142_v37 = vadd.f32 %v1119_v35, %v1072_v33 }
 0x5b0   : > { %v1221_v38 = vadd.f32 %v1198_v36, %v1142_v37 }
 0x5b2   : > { %1223 = vst [vmem:[%s244_s22] sm:$0xff] %v1221_v38 }
 0x5b3 PF: > { %s15_s18 = sadd.s32 1, %s1404_s18  }
 0x5b4   : > { %p12_p4 = scmp.ge.s32.totalorder %s15_s18, 4  }
 0x5b6   :  { %14 = sbr.rel (!%p12_p4) target bundleno = 1 (0x1), region = 90 }

</bundles_post_ra>
